<compile_context>
chip_gen: v6e
topology: v6e:2x2x1
jax: 0.10.0
libtpu: 0.0.40
codegen_flags: <defaults>
</compile_context>

<pallas_src>
import jax
import jax.numpy as jnp
import numpy as np
from jax.experimental import pallas as pl
from jax.experimental.pallas import tpu as pltpu


def speaker_encoder_kernel(ids_ref, emb_ref, w_ref, b_ref, out_ref):
    """ids_ref: VMEM (B, 1)            int32
       emb_ref: VMEM (num_spk, spk_h)  f32   embedding table
       w_ref:   VMEM (hidden, spk_h)   f32   Linear weight (PyTorch layout)
       b_ref:   VMEM (1, hidden)       f32   Linear bias
       out_ref: VMEM (B, hidden)       f32
    """
    b_rows = out_ref.shape[0]
    num_spk = emb_ref.shape[0]

    # One-hot gather matrix on the VPU: (B, num_spk).
    iota = jax.lax.broadcasted_iota(jnp.int32, (b_rows, num_spk), 1)
    one_hot = (iota == ids_ref[...]).astype(jnp.float32)

    # Embedding gather as a single MXU push; exact since selectors are 0/1 and
    # HIGHEST precision keeps the table values in full f32.
    gathered = jnp.dot(
        one_hot,
        emb_ref[...],
        preferred_element_type=jnp.float32,
        precision=jax.lax.Precision.HIGHEST,
    )

    # Linear: gathered @ W.T + b.  Contract the spk_hidden dims directly
    # (dim 1 of both operands) — no explicit transpose materialized.
    y = jax.lax.dot_general(
        gathered,
        w_ref[...],
        dimension_numbers=(((1,), (1,)), ((), ())),
        preferred_element_type=jnp.float32,
        precision=jax.lax.Precision.HIGHEST,
    )
    y = y + b_ref[...]

    # Softsign (exact): y / (1 + |y|).
    out_ref[...] = y / (1.0 + jnp.abs(y))


def speaker_encoder(spk_id, emb_table, w, b):
    """spk_id: (B,) int, emb_table: (num_spk, spk_hidden),
       w: (hidden, spk_hidden), b: (hidden,)  ->  (B, hidden) f32
    """
    B = spk_id.shape[0]
    hidden = w.shape[0]

    ids2d = spk_id.astype(jnp.int32).reshape(B, 1)
    b2d = b.astype(jnp.float32).reshape(1, hidden)

    return pl.pallas_call(
        speaker_encoder_kernel,
        out_shape=jax.ShapeDtypeStruct((B, hidden), jnp.float32),
        in_specs=[
            pl.BlockSpec(memory_space=pltpu.MemorySpace.VMEM),  # ids (B, 1)
            pl.BlockSpec(memory_space=pltpu.MemorySpace.VMEM),  # emb_table
            pl.BlockSpec(memory_space=pltpu.MemorySpace.VMEM),  # w
            pl.BlockSpec(memory_space=pltpu.MemorySpace.VMEM),  # b (1, hidden)
        ],
        out_specs=pl.BlockSpec(memory_space=pltpu.MemorySpace.VMEM),
    )(ids2d, emb_table.astype(jnp.float32), w.astype(jnp.float32), b2d)


if __name__ == "__main__":
    # Hyperparameters (small, consistent with the module's __init__).
    num_spk = 8
    spk_hidden_dim = 32
    hidden_dim = 64
    batch = 4

    key = jax.random.PRNGKey(0)
    k_emb, k_w, k_b, k_id = jax.random.split(key, 4)

    # Deterministic synthetic parameters.
    # nn.Embedding default init ~ N(0, 1).
    emb_table = jax.random.normal(k_emb, (num_spk, spk_hidden_dim), dtype=jnp.float32)
    # nn.Linear default init ~ U(-1/sqrt(fan_in), 1/sqrt(fan_in)).
    bound = 1.0 / np.sqrt(spk_hidden_dim)
    w = jax.random.uniform(k_w, (hidden_dim, spk_hidden_dim), jnp.float32, -bound, bound)
    b = jax.random.uniform(k_b, (hidden_dim,), jnp.float32, -bound, bound)

    # Input speaker ids.
    spk_id = jax.random.randint(k_id, (batch,), 0, num_spk, dtype=jnp.int32)

    run = jax.jit(speaker_encoder)
    out = run(spk_id, emb_table, w, b)
    out = jax.block_until_ready(out)

    # Pure-JAX reference for correctness (same full-precision matmul).
    ref_emb = emb_table[spk_id]
    ref_y = jnp.dot(ref_emb, w.T, precision=jax.lax.Precision.HIGHEST) + b
    ref = ref_y / (1.0 + jnp.abs(ref_y))
    np.testing.assert_allclose(np.asarray(out), np.asarray(ref), rtol=1e-5, atol=1e-5)

    print("KERNEL_OK")
</pallas_src>

<mosaic_0001>
module attributes {stable_mosaic.version = 11 : i64} {
  func.func @speaker_encoder_kernel(%arg0: memref<4x1xi32, #tpu.memory_space<vmem>>, %arg1: memref<8x32xf32, #tpu.memory_space<vmem>>, %arg2: memref<64x32xf32, #tpu.memory_space<vmem>>, %arg3: memref<1x64xf32, #tpu.memory_space<vmem>>, %arg4: memref<4x64xf32, #tpu.memory_space<vmem>>) attributes {dimension_semantics = [], scalar_prefetch = 0 : i64, scratch_operands = 0 : i64, tpu.core_type = #tpu.core_type<tc>} {
    %0 = tpu.iota {dimensions = array<i32: 1>} : vector<4x8xi32>
    %c0 = arith.constant 0 : index
    %c0_0 = arith.constant 0 : index
    %1 = vector.load %arg0[%c0, %c0_0] : memref<4x1xi32, #tpu.memory_space<vmem>>, vector<4x1xi32>
    %2 = vector.broadcast %1 : vector<4x1xi32> to vector<4x8xi32>
    %3 = arith.cmpi eq, %0, %2 : vector<4x8xi32>
    %4 = arith.extui %3 : vector<4x8xi1> to vector<4x8xi32>
    %5 = arith.sitofp %4 : vector<4x8xi32> to vector<4x8xf32>
    %c0_1 = arith.constant 0 : index
    %c0_2 = arith.constant 0 : index
    %6 = vector.load %arg1[%c0_1, %c0_2] : memref<8x32xf32, #tpu.memory_space<vmem>>, vector<8x32xf32>
    %cst = arith.constant dense<0.000000e+00> : vector<4x32xf32>
    %7 = tpu.matmul %5, %6, %cst {dimension_numbers = #tpu.dot_dimension_numbers<[1], [0], [0], [1], [0, 0, 1, 1], [], []>, precision = #tpu.contract_precision<fp32>} : vector<4x8xf32>, vector<8x32xf32>, vector<4x32xf32> -> vector<4x32xf32>
    %c0_3 = arith.constant 0 : index
    %c0_4 = arith.constant 0 : index
    %8 = vector.load %arg2[%c0_3, %c0_4] : memref<64x32xf32, #tpu.memory_space<vmem>>, vector<64x32xf32>
    %cst_5 = arith.constant dense<0.000000e+00> : vector<4x64xf32>
    %9 = tpu.matmul %7, %8, %cst_5 {dimension_numbers = #tpu.dot_dimension_numbers<[1], [1], [0], [0], [0, 0, 1, 0], [], []>, precision = #tpu.contract_precision<fp32>} : vector<4x32xf32>, vector<64x32xf32>, vector<4x64xf32> -> vector<4x64xf32>
    %c0_6 = arith.constant 0 : index
    %c0_7 = arith.constant 0 : index
    %10 = vector.load %arg3[%c0_6, %c0_7] : memref<1x64xf32, #tpu.memory_space<vmem>>, vector<1x64xf32>
    %11 = vector.broadcast %10 : vector<1x64xf32> to vector<4x64xf32>
    %12 = arith.addf %9, %11 : vector<4x64xf32>
    %13 = math.absf %12 : vector<4x64xf32>
    %cst_8 = arith.constant 1.000000e+00 : f32
    %14 = vector.broadcast %cst_8 : f32 to vector<4x64xf32>
    %15 = arith.addf %14, %13 : vector<4x64xf32>
    %16 = arith.divf %12, %15 : vector<4x64xf32>
    %c0_9 = arith.constant 0 : index
    %c0_10 = arith.constant 0 : index
    %17 = vector.load %arg4[%c0_9, %c0_10] : memref<4x64xf32, #tpu.memory_space<vmem>>, vector<4x64xf32>
    tpu.vector_store %arg4[%c0_9, %c0_10], %16 {strides = array<i32>} : memref<4x64xf32, #tpu.memory_space<vmem>>, vector<4x64xf32>,
    return
  }
}

</mosaic_0001>

<bundles_post_ra>
// kernel: speaker_encoder.1
= control target key start
LH: loop header
LB: loop body
LE: loop exit
PB: predicated region body
PF: predicated region fallthrough
CT: control target
= control target key end

     0   :  { %v1322_v2 = vmov 0   ;;  %v1323_v3 = vmov 0.0   ;;  %s1605_s0 = inlined_call_operand.vmem [shape: s32[4,1], index: 0, kind: input, shape index: {}]   ;;  %s1606_s1 = inlined_call_operand.vmem [shape: f32[8,32], index: 1, kind: input, shape index: {}]   ;;  %s1607_s2 = inlined_call_operand.vmem [shape: f32[64,32], index: 2, kind: input, shape index: {}]   ;;  %s1608_s3 = inlined_call_operand.vmem [shape: f32[1,64], index: 3, kind: input, shape index: {}]   ;;  %s1609_s4 = inlined_call_operand.hbm [shape: f32[4,64], index: 4, kind: output, shape index: {}]  }
   0x1   :  { %v20_v0 = vld [vmem:[%s1605_s0] sm:$0xf]  ;;  %1297 = vset.pattern.permute.xlu0 %v1322_v2  ;;  %1154 = vmatprep.subr.mxu1 %v1323_v3 }
   0x2   :  { %v27_v1 = vld [vmem:[%s1606_s1] sm:$0xff] }
   0x3   :  { %v63_v4 = vand.u32 4294901760, %v27_v1 }
   0x4   :  { %9 = vsyncpa [#allocation3], 0  ;;  %22 = vperm.xlu0 %1297, %v20_v0   ;;  %vm1324_vm0 = vmmov 0   ;;  %1149 = vmatprep.subr.mxu0 %v1323_v3  ;;  %v485_v9 = vld [vmem:[%s1607_s2 + $0x38] sm:$0xff]  ;;  %vm493_vm1 = vcmask 261120   ;;  %v484_v11 = vld [vmem:[%s1607_s2 + $0x30] sm:$0xff]  ;;  %v18_v12 = vlaneseq }
   0x5   :  { %1156 = vmatprep.mubr.msk.f32.mxu1 %vm1324_vm0, %v1323_v3  ;;  %v140_v5 = vsub.f32 %v27_v1, %v63_v4  ;;  %1151 = vmatprep.mubr.msk.f32.mxu0 %vm1324_vm0, %v1323_v3  ;;  %v519_v10 = vsel %vm493_vm1, %v485_v9, 0  ;;  %v516_v14 = vsel %vm493_vm1, %v484_v11, 0  ;;  %vm28_vm2 = vcmask 64512   ;;  %v483_v32 = vld [vmem:[%s1607_s2 + $0x28] sm:$0xff]  ;;  %v482_v36 = vld [vmem:[%s1607_s2 + $0x20] sm:$0xff]  ;;  %v481_v42 = vld [vmem:[%s1607_s2 + $0x18] sm:$0xff] }
   0x6   :  { %1150 = vmatpush3.msra.mxu0 %v63_v4  ;;  %v1372_v13 = vand.u32 4294901760, %v519_v10  ;;  %v19_v15 = vand.u32 127, %v18_v12  ;;  %v1378_v17 = vand.u32 4294901760, %v516_v14  ;;  %v513_v33 = vsel %vm493_vm1, %v483_v32, 0  ;;  %v480_v49 = vld [vmem:[%s1607_s2 + $0x10] sm:$0xff]  ;;  %v479_v56 = vld [vmem:[%s1607_s2 + $0x8] sm:$0xff] }
   0x7   :  { %v141_v6 = vand.u32 4294901760, %v140_v5  ;;  %1159 = vmatprep.subr.mxu0 %v1323_v3  ;;  %v1422_v34 = vand.u32 4294901760, %v513_v33  ;;  %v510_v37 = vsel %vm493_vm1, %v482_v36, 0  ;;  %v507_v43 = vsel %vm493_vm1, %v481_v42, 0  ;;  %v478_v63 = vld [vmem:[%s1607_s2] sm:$0xff]  ;;  %s1325_s8 = smov [#allocation2]  }
   0x8   :  { %v1376_v16 = vsub.f32 %v519_v10, %v1372_v13  ;;  %v1383_v21 = vsub.f32 %v516_v14, %v1378_v17  ;;  %v1434_v39 = vand.u32 4294901760, %v510_v37  ;;  %v1449_v46 = vand.u32 4294901760, %v507_v43  ;;  %s1070_s9 = sshll.u32 %s1325_s8, 4  ;;  %s1071_s9 = int_to_ptr.vmem [resolvable:$true] %s1070_s9 }
   0x9   :  { %v142_v7 = vsub.f32 %v140_v5, %v141_v6  ;;  %v1425_v35 = vsub.f32 %v513_v33, %v1422_v34  ;;  %v504_v50 = vsel %vm493_vm1, %v480_v49, 0  ;;  %v501_v57 = vsel %vm493_vm1, %v479_v56, 0  ;;  %p1305_p1 = scmp.lt.s32.totalorder %s1071_s9, %s1071_s9 }
   0xa   :  { %v623_v20 = vand.u32 4294901760, %v1376_v16  ;;  %v630_v26 = vand.u32 4294901760, %v1383_v21  ;;  %v1440_v41 = vsub.f32 %v510_v37, %v1434_v39  ;;  %v1455_v48 = vsub.f32 %v507_v43, %v1449_v46 }
   0xb   :  { %v143_v8 = vand.u32 4294901760, %v142_v7  ;;  %v637_v38 = vand.u32 4294901760, %v1425_v35  ;;  %v1465_v53 = vand.u32 4294901760, %v504_v50  ;;  %v1481_v60 = vand.u32 4294901760, %v501_v57 }
   0xc   :  { %v624_v25 = vsub.f32 %v1376_v16, %v623_v20  ;;  %v631_v30 = vsub.f32 %v1383_v21, %v630_v26  ;;  %v644_v45 = vand.u32 4294901760, %v1440_v41  ;;  %v651_v52 = vand.u32 4294901760, %v1455_v48 }
   0xd   :  { %1155 = vmatpush3.msra.mxu1 %v143_v8  ;;  %v638_v40 = vsub.f32 %v1425_v35, %v637_v38  ;;  %v1471_v55 = vsub.f32 %v504_v50, %v1465_v53  ;;  %v1487_v62 = vsub.f32 %v501_v57, %v1481_v60  ;;  %v498_v0 = vsel %vm493_vm1, %v478_v63, 0 }
   0xe   :  { %1164 = vmatprep.subr.mxu1 %v1323_v3  ;;  %v625_v29 = vand.u32 4294901760, %v624_v25  ;;  %v632_v31 = vand.u32 4294901760, %v631_v30  ;;  %v645_v47 = vsub.f32 %v1440_v41, %v644_v45  ;;  %v652_v54 = vsub.f32 %v1455_v48, %v651_v52 }
   0xf   :  { %v639_v44 = vand.u32 4294901760, %v638_v40  ;;  %v658_v59 = vand.u32 4294901760, %v1471_v55  ;;  %v665_v2 = vand.u32 4294901760, %v1487_v62  ;;  %vm1062_vm4 = vcmask 519168  }
  0x10   :  { %v646_v51 = vand.u32 4294901760, %v645_v47  ;;  %v653_v58 = vand.u32 4294901760, %v652_v54 }
  0x11   :  { %v659_v61 = vsub.f32 %v1471_v55, %v658_v59 }
  0x13   :  { %v660_v1 = vand.u32 4294901760, %v659_v61 }
  0x7f   :  { %v23_v18 = vpop.permute.xlu0 %22 }
  0x80   :  { %vm24_vm3 = vcmp.eq.s32.totalorder %v19_v15, %v23_v18 }
  0x81   :  { %v1078_v19 = vsel %vm24_vm3, 1.0, %v1323_v3 }
  0x82   :  { %v30_v22 = vsel %vm28_vm2, %v1078_v19, 0  ;;  %1157 = vmatmul.mubr.msk.f32.vlgmr.msra.gmra.mxu1 %vm28_vm2, %v1078_v19 }
  0x83   :  { %v99_v23 = vsub.f32 %v30_v22, %v30_v22  ;;  %1165 = vmatpush3.msra.mxu1 %v63_v4  ;;  %1166 = vmatprep.mubr.msk.f32.mxu1 %vm1324_vm0, %v1323_v3 }
  0x84   :  { %1174 = vmatprep.subr.mxu1 %v1323_v3 }
  0x85   :  { %v100_v24 = vand.u32 4294901760, %v99_v23 }
  0x87   :  { %1167 = vmatmul.mubr.f32.vlgmr.msra.gmra.mxu1 %v100_v24  ;;  %v101_v27 = vsub.f32 %v99_v23, %v100_v24 }
  0x88   :  { %1175 = vmatpush3.msra.mxu1 %v63_v4  ;;  %1176 = vmatprep.mubr.msk.f32.mxu1 %vm1324_vm0, %v1323_v3  ;;  %v1497_v4 = vand.u32 4294901760, %v498_v0 }
  0x89   :  { %v102_v28 = vand.u32 4294901760, %v101_v27  ;;  %1198 = vmatprep.subr.mxu1 %v1323_v3 }
  0x8b   :  { %1152 = vmatmul.mubr.f32.vlgmr.msra.gmra.mxu0 %v102_v28  ;;  %1177 = vmatmul.mubr.msk.f32.vlgmr.msra.gmra.mxu1 %vm28_vm2, %v1078_v19 }
  0x8c   :  { %1160 = vmatpush3.msra.mxu0 %v140_v5  ;;  %1161 = vmatprep.mubr.msk.f32.mxu0 %vm1324_vm0, %v1323_v3  ;;  %v666_v5 = vsub.f32 %v1487_v62, %v665_v2 }
  0x8d   :  { %1169 = vmatprep.subr.mxu0 %v1323_v3  ;;  %1199 = vmatpush3.xpose.msra.mxu1 %v625_v29 }
  0x8e   :  { %1200 = vmatprep.subr.mxu1 %v1323_v3  ;;  %1214 = vmatprep.mubr.msk.f32.mxu1 %vm1324_vm0, %v1323_v3  ;;  %v667_v7 = vand.u32 4294901760, %v666_v5 }
  0x8f   :  { %1162 = vmatmul.mubr.f32.vlgmr.msra.gmra.mxu0 %v99_v23 }
  0x90   :  { %1170 = vmatpush3.msra.mxu0 %v141_v6  ;;  %1171 = vmatprep.mubr.msk.f32.mxu0 %vm1324_vm0, %v1323_v3  ;;  %v1503_v6 = vsub.f32 %v498_v0, %v1497_v4 }
  0x91   :  { %1201 = vmatpush3.xpose.msra.mxu1 %v632_v31  ;;  %1179 = vmatprep.subr.mxu0 %v1323_v3 }
  0x92   :  { %1202 = vmatprep.subr.mxu1 %v1323_v3  ;;  %v672_v8 = vand.u32 4294901760, %v1503_v6 }
  0x93   :  { %1172 = vmatmul.mubr.msk.f32.vlgmr.msra.gmra.mxu0 %vm28_vm2, %v1078_v19 }
  0x94   :  { %1180 = vmatpush3.xpose.msra.mxu0 %v1372_v13  ;;  %1195 = vmatprep.mubr.msk.f32.mxu0 %vm1324_vm0, %v1323_v3  ;;  %v673_v9 = vsub.f32 %v1503_v6, %v672_v8 }
  0x95   :  { %1181 = vmatprep.subr.mxu0 %v1323_v3  ;;  %1203 = vmatpush3.xpose.msra.mxu1 %v639_v44 }
  0x96   :  { %1204 = vmatprep.subr.mxu1 %v1323_v3  ;;  %v674_v10 = vand.u32 4294901760, %v673_v9 }
  0x98   :  { %1182 = vmatpush3.xpose.msra.mxu0 %v1378_v17 }
  0x99   :  { %1183 = vmatprep.subr.mxu0 %v1323_v3  ;;  %1205 = vmatpush3.xpose.msra.mxu1 %v646_v51 }
  0x9a   :  { %1206 = vmatprep.subr.mxu1 %v1323_v3 }
  0x9c   :  { %1184 = vmatpush3.xpose.msra.mxu0 %v1422_v34 }
  0x9d   :  { %1185 = vmatprep.subr.mxu0 %v1323_v3  ;;  %1207 = vmatpush3.xpose.msra.mxu1 %v653_v58 }
  0x9e   :  { %1208 = vmatprep.subr.mxu1 %v1323_v3 }
  0xa0   :  { %1186 = vmatpush3.xpose.msra.mxu0 %v1434_v39 }
  0xa1   :  { %1187 = vmatprep.subr.mxu0 %v1323_v3  ;;  %1209 = vmatpush3.xpose.msra.mxu1 %v660_v1 }
  0xa2   :  { %1210 = vmatprep.subr.mxu1 %v1323_v3 }
  0xa4   :  { %1188 = vmatpush3.xpose.msra.mxu0 %v1449_v46 }
  0xa5   :  { %1189 = vmatprep.subr.mxu0 %v1323_v3  ;;  %1211 = vmatpush3.xpose.msra.mxu1 %v667_v7 }
  0xa6   :  { %1212 = vmatprep.subr.mxu1 %v1323_v3 }
  0xa8   :  { %1190 = vmatpush3.xpose.msra.mxu0 %v1465_v53 }
  0xa9   :  { %1191 = vmatprep.subr.mxu0 %v1323_v3  ;;  %1213 = vmatpush3.xpose.msra.mxu1 %v674_v10 }
  0xaa   :  { %1236 = vmatprep.subr.mxu1 %v1323_v3 }
  0xac   :  { %1192 = vmatpush3.xpose.msra.mxu0 %v1481_v60 }
  0xad   :  { %1193 = vmatprep.subr.mxu0 %v1323_v3 }
  0xb0   :  { %1194 = vmatpush3.xpose.msra.mxu0 %v1497_v4 }
  0xb1   :  { %1217 = vmatprep.subr.mxu0 %v1323_v3 }
 0x142   :  { %v180_v11 = vpop.f32.mrf.mxu1 }
 0x144   :  { %v1158_v12 = vpop.f32.mrf.mxu1 }
 0x147   :  { %v328_v14 = vpop.f32.mrf.mxu1 }
 0x149   :  { %v1168_v15 = vpop.f32.mrf.mxu1 }
 0x14b   :  { %v104_v18 = vpop.f32.mrf.mxu0  ;;  %v474_v19 = vpop.f32.mrf.mxu1 }
 0x14c   :  { %v181_v24 = vadd.f32 %v180_v11, %v104_v18 }
 0x14d   :  { %v1153_v22 = vpop.f32.mrf.mxu0  ;;  %v1178_v23 = vpop.f32.mrf.mxu1 }
 0x14f   :  { %v254_v25 = vpop.f32.mrf.mxu0 }
 0x150   :  { %v255_v27 = vadd.f32 %v254_v25, %v181_v24 }
 0x151   :  { %v1163_v28 = vpop.f32.mrf.mxu0 }
 0x152   :  { %v329_v29 = vadd.f32 %v328_v14, %v255_v27 }
 0x153   :  { %v402_v30 = vpop.f32.mrf.mxu0 }
 0x154   :  { %v403_v31 = vadd.f32 %v402_v30, %v329_v29 }
 0x155   :  { %v1173_v32 = vpop.f32.mrf.mxu0 }
 0x156   :  { %v475_v33 = vadd.f32 %v474_v19, %v403_v31 }
 0x158   :  { %v495_v36 = vsel %vm493_vm1, %v475_v33, 0 }
 0x159   :  { %v1515_v37 = vand.u32 4294901760, %v495_v36 }
 0x15b   :  { %v595_v40 = vsub.f32 %v495_v36, %v1515_v37  ;;  %1215 = vmatmul.mubr.f32.vlgmr.msra.gmra.mxu1 %v1515_v37 }
 0x15c   :  { %1237 = vmatpush3.xpose.msra.mxu1 %v1372_v13  ;;  %1252 = vmatprep.mubr.msk.f32.mxu1 %vm1324_vm0, %v1323_v3 }
 0x15d   :  { %1238 = vmatprep.subr.mxu1 %v1323_v3  ;;  %v596_v42 = vand.u32 4294901760, %v595_v40 }
 0x15f   :  { %v597_v43 = vsub.f32 %v595_v40, %v596_v42 }
 0x160   :  { %1239 = vmatpush3.xpose.msra.mxu1 %v1378_v17 }
 0x161   :  { %1240 = vmatprep.subr.mxu1 %v1323_v3  ;;  %v598_v44 = vand.u32 4294901760, %v597_v43 }
 0x163   :  { %1196 = vmatmul.mubr.f32.vlgmr.msra.gmra.mxu0 %v598_v44 }
 0x164   :  { %1218 = vmatpush3.xpose.msra.mxu0 %v1376_v16  ;;  %1241 = vmatpush3.xpose.msra.mxu1 %v1422_v34 }
 0x165   :  { %1219 = vmatprep.subr.mxu0 %v1323_v3  ;;  %1242 = vmatprep.subr.mxu1 %v1323_v3 }
 0x166   :  { %1233 = vmatprep.mubr.msk.f32.mxu0 %vm1324_vm0, %v1323_v3 }
 0x168   :  { %1220 = vmatpush3.xpose.msra.mxu0 %v1383_v21  ;;  %1243 = vmatpush3.xpose.msra.mxu1 %v1434_v39 }
 0x169   :  { %1221 = vmatprep.subr.mxu0 %v1323_v3  ;;  %1244 = vmatprep.subr.mxu1 %v1323_v3 }
 0x16c   :  { %1222 = vmatpush3.xpose.msra.mxu0 %v1425_v35  ;;  %1245 = vmatpush3.xpose.msra.mxu1 %v1449_v46 }
 0x16d   :  { %1223 = vmatprep.subr.mxu0 %v1323_v3  ;;  %1246 = vmatprep.subr.mxu1 %v1323_v3 }
 0x170   :  { %1224 = vmatpush3.xpose.msra.mxu0 %v1440_v41  ;;  %1247 = vmatpush3.xpose.msra.mxu1 %v1465_v53 }
 0x171   :  { %1225 = vmatprep.subr.mxu0 %v1323_v3  ;;  %1248 = vmatprep.subr.mxu1 %v1323_v3 }
 0x174   :  { %1226 = vmatpush3.xpose.msra.mxu0 %v1455_v48  ;;  %1249 = vmatpush3.xpose.msra.mxu1 %v1481_v60 }
 0x175   :  { %1227 = vmatprep.subr.mxu0 %v1323_v3  ;;  %1250 = vmatprep.subr.mxu1 %v1323_v3 }
 0x178   :  { %1228 = vmatpush3.xpose.msra.mxu0 %v1471_v55  ;;  %1251 = vmatpush3.xpose.msra.mxu1 %v1497_v4 }
 0x179   :  { %1229 = vmatprep.subr.mxu0 %v1323_v3  ;;  %1274 = vmatprep.subr.mxu1 %v1323_v3 }
 0x17b   :  { %1253 = vmatmul.mubr.f32.vlgmr.msra.gmra.mxu1 %v596_v42 }
 0x17c   :  { %1230 = vmatpush3.xpose.msra.mxu0 %v1487_v62  ;;  %1275 = vmatpush3.xpose.msra.mxu1 %v1372_v13 }
 0x17d   :  { %1231 = vmatprep.subr.mxu0 %v1323_v3  ;;  %1276 = vmatprep.subr.mxu1 %v1323_v3 }
 0x17e   :  { %1290 = vmatprep.mubr.msk.f32.mxu1 %vm1324_vm0, %v1323_v3 }
 0x180   :  { %1232 = vmatpush3.xpose.msra.mxu0 %v1503_v6  ;;  %1277 = vmatpush3.xpose.msra.mxu1 %v1378_v17 }
 0x181   :  { %1255 = vmatprep.subr.mxu0 %v1323_v3  ;;  %1278 = vmatprep.subr.mxu1 %v1323_v3 }
 0x183   :  { %1234 = vmatmul.mubr.f32.vlgmr.msra.gmra.mxu0 %v595_v40 }
 0x184   :  { %1256 = vmatpush3.xpose.msra.mxu0 %v623_v20  ;;  %1279 = vmatpush3.xpose.msra.mxu1 %v1422_v34 }
 0x185   :  { %1257 = vmatprep.subr.mxu0 %v1323_v3  ;;  %1280 = vmatprep.subr.mxu1 %v1323_v3 }
 0x186   :  { %1271 = vmatprep.mubr.msk.f32.mxu0 %vm1324_vm0, %v1323_v3 }
 0x188   :  { %1258 = vmatpush3.xpose.msra.mxu0 %v630_v26  ;;  %1281 = vmatpush3.xpose.msra.mxu1 %v1434_v39 }
 0x189   :  { %1259 = vmatprep.subr.mxu0 %v1323_v3  ;;  %1282 = vmatprep.subr.mxu1 %v1323_v3 }
 0x18c   :  { %1260 = vmatpush3.xpose.msra.mxu0 %v637_v38  ;;  %1283 = vmatpush3.xpose.msra.mxu1 %v1449_v46  ;;  %v1082_v38 = vld [vmem:[%s1608_s3] ss:$0 sm:$0xff]  ;;  %s1300_s3 = scalar_lea.vmem %s1071_s9, 64 }
 0x18d   :  { %1261 = vmatprep.subr.mxu0 %v1323_v3  ;;  %1284 = vmatprep.subr.mxu1 %v1323_v3  ;;  %p1301_p0 = scmp.ne.s32.totalorder %s1071_s9, %s1300_s3  ;;  %p1306_p2 = scmp.lt.s32.totalorder %s1300_s3, %s1300_s3 }
 0x18f   :  { %p1307_p3 = por %p1306_p2, %p1305_p1 }
 0x190   :  { %1262 = vmatpush3.xpose.msra.mxu0 %v644_v45  ;;  %1285 = vmatpush3.xpose.msra.mxu1 %v1465_v53 }
 0x191   :  { %1263 = vmatprep.subr.mxu0 %v1323_v3  ;;  %1286 = vmatprep.subr.mxu1 %v1323_v3  ;;  %p1308_p4 = pnand %p1307_p3, %p1301_p0 }
 0x194   :  { %1264 = vmatpush3.xpose.msra.mxu0 %v651_v52  ;;  %1287 = vmatpush3.xpose.msra.mxu1 %v1481_v60 }
 0x195   :  { %1265 = vmatprep.subr.mxu0 %v1323_v3  ;;  %1288 = vmatprep.subr.mxu1 %v1323_v3 }
 0x198   :  { %1266 = vmatpush3.xpose.msra.mxu0 %v658_v59  ;;  %1289 = vmatpush3.xpose.msra.mxu1 %v1497_v4 }
 0x199   :  { %1267 = vmatprep.subr.mxu0 %v1323_v3 }
 0x19b   :  { %1291 = vmatmul.mubr.f32.vlgmr.msra.gmra.mxu1 %v1515_v37 }
 0x19c   :  { %1268 = vmatpush3.xpose.msra.mxu0 %v665_v2 }
 0x19d   :  { %1269 = vmatprep.subr.mxu0 %v1323_v3 }
 0x1a0   :  { %1270 = vmatpush3.xpose.msra.mxu0 %v672_v8 }
 0x1a3   :  { %1272 = vmatmul.mubr.f32.vlgmr.msra.gmra.mxu0 %v1515_v37 }
 0x21b   :  { %v711_v13 = vpop.f32.mrf.mxu1 }
 0x21d   :  { %v1216_v16 = vpop.f32.mrf.mxu1 }
 0x223   :  { %v600_v17 = vpop.f32.mrf.mxu0 }
 0x224   :  { %v601_v39 = vadd.f32 %v1082_v38, %v600_v17 }
 0x225   :  { %v1197_v20 = vpop.f32.mrf.mxu0 }
 0x226   :  { %v712_v3 = vadd.f32 %v711_v13, %v601_v39 }
 0x23b   :  { %v880_v21 = vpop.f32.mrf.mxu1 }
 0x23d   :  { %v1254_v26 = vpop.f32.mrf.mxu1 }
 0x243   :  { %v799_v34 = vpop.f32.mrf.mxu0 }
 0x244   :  { %v800_v46 = vadd.f32 %v799_v34, %v712_v3 }
 0x245   :  { %v1235_v35 = vpop.f32.mrf.mxu0 }
 0x246   :  { %v881_v47 = vadd.f32 %v880_v21, %v800_v46 }
 0x25b   :  { %v1054_v41 = vpop.f32.mrf.mxu1 }
 0x25d   :  { %v1292_v45 = vpop.f32.mrf.mxu1 }
 0x263   :  { %v975_v48 = vpop.f32.mrf.mxu0 }
 0x264   :  { %v976_v49 = vadd.f32 %v975_v48, %v881_v47 }
 0x265   :  { %v1273_v50 = vpop.f32.mrf.mxu0 }
 0x266   :  { %v1055_v51 = vadd.f32 %v1054_v41, %v976_v49 }
 0x268   :  { %v1058_v52 = vand.u32 2147483647, %v1055_v51 }
 0x26a   :  { %v1059_v53 = vadd.f32 1.0, %v1058_v52 }
 0x26c   :  { %1298 = vrcp.f32 %v1059_v53 }
 0x279   :  { %v1299_v54 = vpop.eup %1298 }
 0x27a   :  { %v1061_v55 = vmul.f32 %v1299_v54, %v1055_v51 }
 0x27c   :  { %1063 = vst.msk [vmem:[#allocation2] sm:$0xf] %vm1062_vm4, %v1061_v55 }
 0x27d   :  { %1311 = shalt.err (!%p1308_p4)
}
 0x27e   :  { %1073 = dma.vmem_to_hbm [thread:$0]  %s1071_s9, 64, %s1609_s4, [#allocation3]  }
 0x27f   :  { %1320 = dma.done.wait [#allocation3], 64  }
 0x280   :  { %1321 = vsyncadd [#allocation3], 4294967232 }
 0x281   :  { %1077 = vsyncpa [#allocation3], 1 }

</bundles_post_ra>
